<compile_context>
chip_gen: v6e
topology: v6e:2x2x1
jax: 0.10.0
libtpu: 0.0.40
codegen_flags: <defaults>
</compile_context>

<pallas_src>
import functools

import jax
import jax.numpy as jnp
from jax import lax
from jax.experimental import pallas as pl
from jax.experimental.pallas import tpu as pltpu


def _round_up(x, m):
    return (x + m - 1) // m * m


def _vmem_limit_bytes():
    # ~3/4 of physical VMEM, capped at 100 MiB:
    #   v5e/v6e (128 MiB) -> 96 MiB, v7x (64 MiB) -> 48 MiB.
    try:
        cap = int(pltpu.get_tpu_info().vmem_capacity_bytes)
    except Exception:  # conservative fallback, safe on every generation
        cap = 64 * 1024 * 1024
    return int(min(cap * 3 // 4, 100 * 1024 * 1024))


def _pick_tiling(batch, row_tile):
    """Return (tile_m, padded_batch, num_tiles).

    * >= 2 tiles whenever possible so v7x's two TensorCores both get work on
      the single "parallel" grid axis.
    * tile_m = ceil(B / n_tiles) rounded to a sublane multiple -> minimal
      row/column padding while still feeding the wide MXU.
    """
    if batch <= 8:
        tm = _round_up(max(batch, 1), 8)
        return tm, tm, 1
    n_tiles = max(2, -(-batch // row_tile))
    tm = _round_up(-(-batch // n_tiles), 8)
    return tm, n_tiles * tm, n_tiles


def _supcon_kernel(labc_ref, labr_ref, fall_ref, out_ref, *,
                   inv_temp, n_valid, tile_m, exact_eps):
    i = pl.program_id(0)

    f_all = fall_ref[...]                               # (Bp, Dp) bf16 (resident)
    bp = f_all.shape[0]
    padded = bp != n_valid                               # static Python bool

    # Row tile sliced from the resident full-feature buffer: no second input
    # stream, no duplicated HBM read, no extra double-buffered VMEM block.
    row_start = pl.multiple_of(i * tile_m, 8)
    f = fall_ref[pl.ds(row_start, tile_m), :]            # (TM, Dp)

    # (TM, Bp) tile of features @ features.T; bf16 operands, f32 MXU accum.
    gram = lax.dot_general(
        f, f_all,
        dimension_numbers=(((1,), (1,)), ((), ())),
        preferred_element_type=jnp.float32,
    )

    row = lax.broadcasted_iota(jnp.int32, (tile_m, bp), 0) + i * tile_m
    col = lax.broadcasted_iota(jnp.int32, (tile_m, bp), 1)
    diag = row == col

    # masked_fill(diag, -1e9) with 1/temperature folded into one constant:
    #   sim = gram * mask / T == gram * where(diag, -1e9/T, 1/T)
    inv_t = jnp.float32(inv_temp)
    sim = gram * jnp.where(diag, jnp.float32(-1e9) * inv_t, inv_t)
    if padded:
        valid_col = col < n_valid
        # Large-finite sentinel (not -inf) so exp(sim - m) stays NaN-free.
        sim = jnp.where(valid_col, sim, jnp.float32(-1e30))

    m = jnp.max(sim, axis=-1, keepdims=True)
    e = jnp.exp(sim - m)
    denom = jnp.sum(e, axis=-1, keepdims=True)           # >= 1, never zero
    log_denom = jnp.log(denom)
    if exact_eps:
        # Exact log(softmax(sim) + 1e-9) without a (TM, Bp) divide:
        #   log(e/denom + eps) == log(e + denom*eps) - log(denom)
        # NOTE: this second full-tile log makes the kernel EUP-bound for small
        # D; it is required for exact parity with the PyTorch module.
        log_p = jnp.log(e + denom * jnp.float32(1e-9)) - log_denom
    else:
        # Fast path: plain log-softmax; differs from the reference only where a
        # softmax probability is below ~1e-9.
        log_p = (sim - m) - log_denom

    # Positives: same label, off-diagonal.  Labels arrive in both layouts so no
    # in-kernel XLU transpose is needed.
    pos = jnp.logical_and(labc_ref[...] == labr_ref[...], jnp.logical_not(diag))
    if padded:
        pos = jnp.logical_and(pos, valid_col)

    num = jnp.sum(jnp.where(pos, log_p, jnp.float32(0.0)), axis=-1, keepdims=True)
    cnt = jnp.sum(jnp.where(pos, jnp.float32(1.0), jnp.float32(0.0)),
                  axis=-1, keepdims=True)
    # Rows with zero positives give 0 / (0 + 1e-9) == 0, as in the reference.
    mean_log_prob = num / (cnt + jnp.float32(1e-9))

    if padded:
        row_valid = (lax.broadcasted_iota(jnp.int32, (tile_m, 1), 0)
                     + i * tile_m) < n_valid
        mean_log_prob = jnp.where(row_valid, mean_log_prob, jnp.float32(0.0))

    # Lane-dense partial-sum slab (unmasked vst); reduced to the scalar loss in
    # the wrapper.
    out_ref[...] = jnp.full((1, 8, 128), jnp.sum(mean_log_prob), dtype=jnp.float32)


def supervised_contrastive_loss(features, labels, temperature=0.1, *,
                                row_tile=256, compute_dtype=jnp.bfloat16,
                                exact_eps=True):
    """Pallas TPU implementation of SupervisedContrastiveLoss.forward."""
    B, D = features.shape
    tm, b_pad, num_tiles = _pick_tiling(B, row_tile)
    d_pad = _round_up(D, 128)

    # bf16 operands are MXU-native on v5e/v6e/v7x (accumulation stays f32) and
    # halve the resident full-feature buffer.
    feats = features.astype(compute_dtype)
    if (b_pad, d_pad) != (B, D):
        feats = jnp.pad(feats, ((0, b_pad - B), (0, d_pad - D)))

    lab = labels.reshape(-1).astype(jnp.int32)
    if b_pad != B:
        lab = jnp.pad(lab, (0, b_pad - B), constant_values=-1)
    lab_col = lab.reshape(b_pad, 1)
    lab_row = lab.reshape(1, b_pad)

    kernel = functools.partial(
        _supcon_kernel,
        inv_temp=float(1.0 / temperature),
        n_valid=B,
        tile_m=tm,
        exact_eps=exact_eps,
    )

    cost = pl.CostEstimate(
        flops=2 * b_pad * b_pad * d_pad,
        transcendentals=(2 if exact_eps else 1) * b_pad * b_pad,
        bytes_accessed=int(feats.size) * feats.dtype.itemsize
        + int(lab_col.size + lab_row.size) * 4
        + num_tiles * 8 * 128 * 4,
    )

    partials = pl.pallas_call(
        kernel,
        out_shape=jax.ShapeDtypeStruct((num_tiles, 8, 128), jnp.float32),
        grid=(num_tiles,),
        in_specs=[
            pl.BlockSpec((tm, 1), lambda i: (i, 0)),         # labels, column layout
            pl.BlockSpec((1, b_pad), lambda i: (0, 0)),      # labels, lane-dense row
            pl.BlockSpec((b_pad, d_pad), lambda i: (0, 0)),  # full features, resident
        ],
        out_specs=pl.BlockSpec((1, 8, 128), lambda i: (i, 0, 0)),
        compiler_params=pltpu.CompilerParams(
            dimension_semantics=("parallel",),    # row tiles are independent
            vmem_limit_bytes=_vmem_limit_bytes(),
        ),
        cost_estimate=cost,
    )(lab_col, lab_row, feats)

    # TODO(synk): for very large B (Bp*Dp approaching the v7x VMEM limit), add a
    # second "arbitrary" grid axis over column tiles with flash-style running
    # max/denominator carries so VMEM no longer scales with B.
    return -jnp.sum(partials[:, 0, 0]) * (1.0 / B)


def _reference_loss(features, labels, temperature=0.1):
    """Plain-JAX reference mirroring the PyTorch module, for verification."""
    B = features.shape[0]
    labels = labels.reshape(-1, 1)
    diag = jnp.eye(B, dtype=bool)
    mask = jnp.where(diag, -1000000000.0, 1.0).astype(jnp.float32)
    f = features.astype(jnp.float32)
    sim = (f @ f.T) * mask / temperature
    sim = jax.nn.softmax(sim, axis=-1)
    log_sim = jnp.log(sim + 1e-9)
    sim_mask = (jnp.equal(labels, labels.T) & ~diag).astype(jnp.float32)
    mean_log_prob = (sim_mask * log_sim).sum(-1) / (sim_mask.sum(-1) + 1e-9)
    return -mean_log_prob.mean()


if __name__ == "__main__":
    key = jax.random.PRNGKey(0)

    # (8, 32):   single tile, D padded to 128 lanes.
    # (20, 96):  two row tiles (tm=16) with padded rows/columns inside tiles.
    # (150, 64): two row tiles (tm=80) with padded rows, multi-class labels.
    for (B, D) in [(8, 32), (20, 96), (150, 64)]:
        kf, kl, key = jax.random.split(key, 3)
        features = jax.random.normal(kf, (B, D), dtype=jnp.float32)
        labels = jax.random.randint(kl, (B,), minval=0, maxval=4, dtype=jnp.int32)

        loss = supervised_contrastive_loss(features, labels, temperature=0.1)
        loss = jax.block_until_ready(loss)

        # Tight check: run the same bf16-rounded operands through the pure-JAX
        # reference (isolates kernel math from the bf16 operand-rounding
        # trade-off recommended by the perf review).
        feats_bf16 = features.astype(jnp.bfloat16).astype(jnp.float32)
        ref_tight = _reference_loss(feats_bf16, labels, temperature=0.1)
        assert jnp.allclose(loss, ref_tight, rtol=2e-3, atol=2e-3), (
            B, D, float(loss), float(ref_tight))

        # Loose check against the full-f32 reference documents the bf16 drift.
        ref_f32 = _reference_loss(features, labels, temperature=0.1)
        assert jnp.allclose(loss, ref_f32, rtol=5e-2, atol=5e-1), (
            B, D, float(loss), float(ref_f32))

    print("KERNEL_OK")
</pallas_src>

<mosaic_0001>
module attributes {stable_mosaic.version = 11 : i64} {
  func.func @_supcon_kernel(%arg0: i32, %arg1: memref<8x1xi32, #tpu.memory_space<vmem>>, %arg2: memref<1x8xi32, #tpu.memory_space<vmem>>, %arg3: memref<8x128xbf16, #tpu.memory_space<vmem>>, %arg4: memref<1x8x128xf32, #tpu.memory_space<vmem>>) attributes {dimension_semantics = [#tpu.dimension_semantics<parallel>], iteration_bounds = array<i64: 1>, scalar_prefetch = 0 : i64, scratch_operands = 0 : i64, tpu.core_type = #tpu.core_type<tc>, window_params = [{transform_indices = @transform_0, window_bounds = array<i64: 8, 1>}, {pipeline_mode = #tpu.pipeline_mode<synchronous>, transform_indices = @transform_1, window_bounds = array<i64: 1, 8>}, {pipeline_mode = #tpu.pipeline_mode<synchronous>, transform_indices = @transform_2, window_bounds = array<i64: 8, 128>}, {transform_indices = @transform_3, window_bounds = array<i64: 1, 8, 128>}]} {
    %c0 = arith.constant 0 : index
    %c0_0 = arith.constant 0 : index
    %0 = vector.load %arg3[%c0, %c0_0] : memref<8x128xbf16, #tpu.memory_space<vmem>>, vector<8x128xbf16>
    %c8_i32 = arith.constant 8 : i32
    %1 = arith.muli %arg0, %c8_i32 : i32
    %2 = tpu.assume_multiple %1, 8 : i32
    %3 = arith.index_cast %2 : i32 to index
    %c0_1 = arith.constant 0 : index
    %4 = vector.load %arg3[%3, %c0_1] : memref<8x128xbf16, #tpu.memory_space<vmem>>, vector<8x128xbf16>
    %cst = arith.constant dense<0.000000e+00> : vector<8x8xf32>
    %5 = tpu.matmul %4, %0, %cst {dimension_numbers = #tpu.dot_dimension_numbers<[1], [1], [0], [0], [0, 0, 1, 0], [], []>} : vector<8x128xbf16>, vector<8x128xbf16>, vector<8x8xf32> -> vector<8x8xf32>
    %6 = tpu.iota {dimensions = array<i32: 0>} : vector<8x8xi32>
    %c8_i32_2 = arith.constant 8 : i32
    %7 = arith.muli %arg0, %c8_i32_2 : i32
    %8 = vector.broadcast %7 : i32 to vector<8x8xi32>
    %9 = arith.addi %6, %8 : vector<8x8xi32>
    %10 = tpu.iota {dimensions = array<i32: 1>} : vector<8x8xi32>
    %11 = arith.cmpi eq, %9, %10 : vector<8x8xi32>
    %cst_3 = arith.constant -1.000000e+09 : f32
    %cst_4 = arith.constant 1.000000e+01 : f32
    %12 = arith.mulf %cst_3, %cst_4 : f32
    %cst_5 = arith.constant 1.000000e+01 : f32
    %13 = vector.broadcast %12 : f32 to vector<8x8xf32>
    %14 = vector.broadcast %cst_5 : f32 to vector<8x8xf32>
    %15 = arith.select %11, %13, %14 : vector<8x8xi1>, vector<8x8xf32>
    %16 = arith.mulf %5, %15 : vector<8x8xf32>
    %cst_6 = arith.constant dense<0xFF800000> : vector<8xf32>
    %17 = vector.multi_reduction <maximumf>, %16, %cst_6 [1] : vector<8x8xf32> to vector<8xf32>
    %18 = vector.shape_cast %17 : vector<8xf32> to vector<8x1xf32>
    %19 = vector.broadcast %18 : vector<8x1xf32> to vector<8x8xf32>
    %20 = arith.subf %16, %19 : vector<8x8xf32>
    %21 = math.exp %20 : vector<8x8xf32>
    %cst_7 = arith.constant dense<0.000000e+00> : vector<8xf32>
    %22 = vector.multi_reduction <add>, %21, %cst_7 [1] : vector<8x8xf32> to vector<8xf32>
    %23 = vector.shape_cast %22 : vector<8xf32> to vector<8x1xf32>
    %24 = math.log %23 : vector<8x1xf32>
    %cst_8 = arith.constant 9.99999971E-10 : f32
    %25 = vector.broadcast %cst_8 : f32 to vector<8x1xf32>
    %26 = arith.mulf %23, %25 : vector<8x1xf32>
    %27 = vector.broadcast %26 : vector<8x1xf32> to vector<8x8xf32>
    %28 = arith.addf %21, %27 : vector<8x8xf32>
    %29 = math.log %28 : vector<8x8xf32>
    %30 = vector.broadcast %24 : vector<8x1xf32> to vector<8x8xf32>
    %31 = arith.subf %29, %30 : vector<8x8xf32>
    %c0_9 = arith.constant 0 : index
    %c0_10 = arith.constant 0 : index
    %32 = vector.load %arg1[%c0_9, %c0_10] : memref<8x1xi32, #tpu.memory_space<vmem>>, vector<8x1xi32>
    %c0_11 = arith.constant 0 : index
    %c0_12 = arith.constant 0 : index
    %33 = vector.load %arg2[%c0_11, %c0_12] : memref<1x8xi32, #tpu.memory_space<vmem>>, vector<1x8xi32>
    %34 = vector.broadcast %32 : vector<8x1xi32> to vector<8x8xi32>
    %35 = vector.broadcast %33 : vector<1x8xi32> to vector<8x8xi32>
    %36 = arith.cmpi eq, %34, %35 : vector<8x8xi32>
    %cst_13 = arith.constant dense<true> : vector<8x8xi1>
    %37 = arith.xori %11, %cst_13 : vector<8x8xi1>
    %38 = arith.andi %36, %37 : vector<8x8xi1>
    %cst_14 = arith.constant 0.000000e+00 : f32
    %39 = vector.broadcast %cst_14 : f32 to vector<8x8xf32>
    %40 = arith.select %38, %31, %39 : vector<8x8xi1>, vector<8x8xf32>
    %cst_15 = arith.constant dense<0.000000e+00> : vector<8xf32>
    %41 = vector.multi_reduction <add>, %40, %cst_15 [1] : vector<8x8xf32> to vector<8xf32>
    %42 = vector.shape_cast %41 : vector<8xf32> to vector<8x1xf32>
    %cst_16 = arith.constant 1.000000e+00 : f32
    %cst_17 = arith.constant 0.000000e+00 : f32
    %43 = vector.broadcast %cst_16 : f32 to vector<8x8xf32>
    %44 = vector.broadcast %cst_17 : f32 to vector<8x8xf32>
    %45 = arith.select %38, %43, %44 : vector<8x8xi1>, vector<8x8xf32>
    %cst_18 = arith.constant dense<0.000000e+00> : vector<8xf32>
    %46 = vector.multi_reduction <add>, %45, %cst_18 [1] : vector<8x8xf32> to vector<8xf32>
    %47 = vector.shape_cast %46 : vector<8xf32> to vector<8x1xf32>
    %cst_19 = arith.constant 9.99999971E-10 : f32
    %48 = vector.broadcast %cst_19 : f32 to vector<8x1xf32>
    %49 = arith.addf %47, %48 : vector<8x1xf32>
    %50 = arith.divf %42, %49 : vector<8x1xf32>
    %51 = vector.shape_cast %50 : vector<8x1xf32> to vector<1x8x1xf32>
    %cst_20 = arith.constant dense<0.000000e+00> : vector<1xf32>
    %52 = vector.multi_reduction <add>, %51, %cst_20 [1, 2] : vector<1x8x1xf32> to vector<1xf32>
    %53 = vector.shape_cast %52 : vector<1xf32> to vector<1x1x1xf32>
    %54 = vector.extract %53[0, 0, 0] : f32 from vector<1x1x1xf32>
    %55 = vector.broadcast %54 : f32 to vector<1x8x128xf32>
    %c0_21 = arith.constant 0 : index
    %c0_22 = arith.constant 0 : index
    %c0_23 = arith.constant 0 : index
    %56 = vector.load %arg4[%c0_21, %c0_22, %c0_23] : memref<1x8x128xf32, #tpu.memory_space<vmem>>, vector<1x8x128xf32>
    tpu.vector_store %arg4[%c0_21, %c0_22, %c0_23], %55 {strides = array<i32>} : memref<1x8x128xf32, #tpu.memory_space<vmem>>, vector<1x8x128xf32>,
    return
  }
  func.func @transform_0(%arg0: i32) -> (i32, i32) {
    %c0_i32 = arith.constant 0 : i32
    %c0_i32_0 = arith.constant 0 : i32
    return %arg0, %c0_i32 : i32, i32
  }
  func.func @transform_1(%arg0: i32) -> (i32, i32) {
    %c0_i32 = arith.constant 0 : i32
    %c0_i32_0 = arith.constant 0 : i32
    %c0_i32_1 = arith.constant 0 : i32
    return %c0_i32, %c0_i32_0 : i32, i32
  }
  func.func @transform_2(%arg0: i32) -> (i32, i32) {
    %c0_i32 = arith.constant 0 : i32
    %c0_i32_0 = arith.constant 0 : i32
    %c0_i32_1 = arith.constant 0 : i32
    return %c0_i32, %c0_i32_0 : i32, i32
  }
  func.func @transform_3(%arg0: i32) -> (i32, i32, i32) {
    %c0_i32 = arith.constant 0 : i32
    %c0_i32_0 = arith.constant 0 : i32
    %c0_i32_1 = arith.constant 0 : i32
    return %arg0, %c0_i32, %c0_i32_0 : i32, i32, i32
  }
}

</mosaic_0001>

<bundles_post_ra>
// kernel: tpu_custom_call.1
= control target key start
LH: loop header
LB: loop body
LE: loop exit
PB: predicated region body
PF: predicated region fallthrough
CT: control target
= control target key end

     0   :  { %v190_v1 = vmov 0.0   ;;  %vm191_vm0 = vmmov 0   ;;  %s237_s0 = inlined_call_operand.vmem [shape: s32[8,1], index: 0, kind: input, shape index: {}]   ;;  %s238_s1 = inlined_call_operand.vmem [shape: s32[1,8], index: 1, kind: input, shape index: {}]   ;;  %s239_s2 = inlined_call_operand.vmem [shape: bf16[8,128], index: 2, kind: input, shape index: {}]   ;;  %s240_s3 = inlined_call_operand.hbm [shape: f32[1,8,128], index: 3, kind: output, shape index: {}]  }
   0x1   :  { %v16_v0 = vld [vmem:[%s239_s2] sm:$0xf]  ;;  %144 = vmatprep.subr.bf16.mxu0 %v190_v1  ;;  %146 = vmatprep.mubr.msk.bf16.mxu0 %vm191_vm0, %v190_v1 }
   0x2   :  { %8 = vsyncpa [#allocation3], 0  ;;  %145 = vmatpush3.bf16.xpose.msra.mxu0 %v16_v0  ;;  %v22_v2 = vld [vmem:[%s239_s2] sm:$0xf]  ;;  %v63_v3 = vlaneseq  ;;  %v192_v6 = vmov 10.0   ;;  %vm72_vm2 = vcmask 64512  }
   0x3   :  { %v89_v14 = vld [vmem:[%s237_s0] sm:$0xff]  ;;  %v193_v15 = vmov 0   ;;  %vm194_vm4 = vmmov 1   ;;  %vm112_vm7 = vcmask 7168   ;;  %s195_s0 = smov [#allocation2]  }
   0x4   :  { %v64_v4 = vshrl.u32 %v63_v3, 7  ;;  %v68_v5 = vand.u32 127, %v63_v3  ;;  %158 = vset.pattern.permute.xlu1 %v193_v15  ;;  %159 = vset.pattern.permute.xlu0 %v193_v15  ;;  %v141_v21 = vld [vmem:[%s238_s1] ss:$0 sm:$0xff]  ;;  %s131_s1 = sshll.u32 %s195_s0, 4  ;;  %s132_s1 = int_to_ptr.vmem [resolvable:$true] %s131_s1 }
   0x5   :  { %92 = vperm.xlu1 %158, %v89_v14   ;;  %s168_s20 = scalar_lea.vmem %s132_s1, 128  ;;  %p173_p1 = scmp.lt.s32.totalorder %s132_s1, %s132_s1 }
   0x6   :  { %vm69_vm1 = vcmp.eq.s32.totalorder %v64_v4, %v68_v5  ;;  %p169_p0 = scmp.ne.s32.totalorder %s132_s1, %s168_s20  ;;  %p174_p2 = scmp.lt.s32.totalorder %s168_s20, %s168_s20 }
   0x7   :  { %v70_v7 = vsel %vm69_vm1, -1e+10, %v192_v6  ;;  %vm99_vm5 = vmxor %vm69_vm1, %vm194_vm4 }
   0x8   :  { %p175_p3 = por %p174_p2, %p173_p1 }
   0x9   :  { %147 = vmatmul.mubr.bf16.vlgmr.msra.gmra.mxu0 %v22_v2 }
   0xa   :  { %p176_p4 = pnand %p175_p3, %p169_p0 }
  0x80   :  { %v93_v22 = vpop.permute.xlu1 %92 }
  0x81   :  { %vm98_vm3 = vcmp.eq.s32.totalorder %v93_v22, %v141_v21 }
  0x82   :  { %vm100_vm6 = vmand %vm98_vm3, %vm99_vm5 }
  0x83   :  { %v105_v23 = vsel %vm100_vm6, 1.0, %v190_v1 }
  0x84   :  { %v106_v24 = vsel %vm72_vm2, %v105_v23, 0.0 }
  0x85   :  { %107 = vadd.xlane.f32.xlu1 %v106_v24 }
  0xc9   :  { %v57_v8 = vpop.f32.mrf.mxu0 }
  0xca   :  { %v71_v9 = vmul.f32 %v70_v7, %v57_v8 }
  0xcb   :  { %v148_v10 = vpop.f32.mrf.mxu0 }
  0xcc   :  { %v73_v11 = vsel %vm72_vm2, %v71_v9, -inf }
  0xcd   :  { %74 = vmax.xlane.f32.xlu0 %v73_v11  ;;  %v60_v12 = vpop.f32.mrf.mxu0 }
  0xcf   :  { %v149_v13 = vpop.f32.mrf.mxu0 }
 0x10e   :  { %v108_v35 = vpop.xlane.xlu1 %107 }
 0x10f   :  { %v109_v36 = vadd.f32 1e-09, %v108_v35 }
 0x156   :  { %v75_v16 = vpop.xlane.xlu0 %74 }
 0x157   :  { %v76_v17 = vsub.f32 %v71_v9, %v75_v16 }
 0x159   :  { %v77_v18 = vmul.f32 1.442695, %v76_v17 }
 0x15b   :  { %160 = vpow2.f32 %v77_v18 }
 0x168   :  { %v161_v19 = vpop.eup %160 }
 0x169   :  { %v79_v20 = vsel %vm72_vm2, %v161_v19, 0.0 }
 0x16a   :  { %80 = vadd.xlane.f32.xlu0 %v79_v20 }
 0x1f3   :  { %v81_v25 = vpop.xlane.xlu0 %80 }
 0x1f4   :  { %v84_v26 = vmul.f32 1e-09, %v81_v25  ;;  %162 = vlog2.f32 %v81_v25 }
 0x1f6   :  { %v85_v27 = vadd.f32 %v161_v19, %v84_v26 }
 0x1f8   :  { %164 = vlog2.f32 %v85_v27 }
 0x1f9   :  { %166 = vrcp.f32 %v109_v36 }
 0x201   :  { %v163_v28 = vpop.eup %162 }
 0x202   :  { %v83_v30 = vmul.f32 0.6931472, %v163_v28 }
 0x205   :  { %v165_v29 = vpop.eup %164 }
 0x206   :  { %v87_v31 = vmul.f32 0.6931472, %v165_v29  ;;  %v167_v37 = vpop.eup %166 }
 0x208   :  { %v88_v32 = vsub.f32 %v87_v31, %v83_v30 }
 0x20a   :  { %v101_v33 = vsel %vm100_vm6, %v88_v32, 0.0 }
 0x20b   :  { %v102_v34 = vsel %vm72_vm2, %v101_v33, 0.0 }
 0x20c   :  { %103 = vadd.xlane.f32.xlu0 %v102_v34 }
 0x295   :  { %v104_v38 = vpop.xlane.xlu0 %103 }
 0x296   :  { %v111_v39 = vmul.f32 %v167_v37, %v104_v38 }
 0x298   :  { %v113_v40 = vsel %vm112_vm7, %v111_v39, 0.0 }
 0x299   :  { %114 = vadd.xlane.f32.xlu0 %v113_v40 }
 0x322   :  { %v115_v41 = vpop.xlane.xlu0 %114 }
 0x323   :  { %v116_v42 = vrot.slane %v115_v41, 4 }
 0x325   :  { %v117_v43 = vadd.f32 %v116_v42, %v115_v41 }
 0x327   :  { %v118_v44 = vrot.slane %v117_v43, 2 }
 0x329   :  { %v119_v45 = vadd.f32 %v118_v44, %v117_v43 }
 0x32b   :  { %v120_v46 = vrot.slane %v119_v45, 1 }
 0x32d   :  { %v121_v47 = vadd.f32 %v120_v46, %v119_v45 }
 0x32f   :  { %150 = vpush %v121_v47 }
 0x360   :  { %s151_s19 = spop %150 }
 0x361   :  { %v123_v48 = vstv %s151_s19 }
 0x362   :  { %124 = vst [vmem:[#allocation2] sm:$0xff] %v123_v48 }
 0x363   :  { %179 = shalt.err (!%p176_p4)
}
 0x364   :  { %134 = dma.vmem_to_hbm [thread:$0]  %s132_s1, 128, %s240_s3, [#allocation3]  }
 0x365   :  { %188 = dma.done.wait [#allocation3], 128  }
 0x366   :  { %189 = vsyncadd [#allocation3], 4294967168 }
 0x367   :  { %138 = vsyncpa [#allocation3], 1 }

</bundles_post_ra>
